<compile_context>
chip_gen: v7x
topology: tpu7x:2x2x1
jax: 0.10.0
libtpu: 0.0.40
codegen_flags: <defaults>
</compile_context>

<pallas_src>
import functools

import jax
import jax.numpy as jnp
from jax.experimental import pallas as pl
from jax.experimental.pallas import tpu as pltpu


def _round_down_128(x):
    return (x // 128) * 128


def _vmem_ceiling_bytes():
    """~50% of physical VMEM (generation-aware), conservative fallback."""
    try:
        cap = int(pltpu.get_tpu_info().vmem_capacity_bytes)
    except Exception:
        cap = 64 << 20                      # v7x-sized conservative fallback
    return max(cap // 2, 16 << 20)


def _tversky_sums_kernel(logits_ref, labels_ref, out_ref, *,
                         n_total, tile_n, tiles_per_group, any_partial, binary):
    """Accumulate lane-dense per-class partial sums into the resident out block.

    logits_ref : (C_in, tile_n)   wire dtype (f32 upcast in-kernel)
    labels_ref : (1, tile_n)      int8 / int32
    out_ref    : (3, C_k, W) f32  resident over the inner lane-tile axis; rows =
                 [sum(p*onehot), sum(p), sum(onehot)], still spread over W lanes
                 (the W->1 reduce happens in the JAX epilogue).
    """
    g = pl.program_id(1)
    i = pl.program_id(2)

    @pl.when(i == 0)
    def _():
        out_ref[...] = jnp.zeros_like(out_ref)

    def chunk_sum(a):
        # (rows, tn) -> (rows, W): tree-add the 128-lane chunks.  Static,
        # lane-tile-aligned slices => pure VPU adds, no XLU, no relayout.
        tn = a.shape[-1]
        w = 128 if tn >= 128 else tn
        chunks = [a[:, j * w:(j + 1) * w] for j in range(tn // w)]
        while len(chunks) > 1:
            nxt = [chunks[j] + chunks[j + 1]
                   for j in range(0, len(chunks) - 1, 2)]
            if len(chunks) % 2:
                nxt.append(chunks[-1])
            chunks = nxt
        return chunks[0]

    def accumulate(use_mask):
        x = logits_ref[...].astype(jnp.float32)            # (C_in, TN)
        lab = labels_ref[...].astype(jnp.int32)            # (1, TN)
        c_in, tn = x.shape

        if use_mask:
            # Sanitize out-of-range lanes BEFORE exp / compares so stale padded
            # VMEM (possibly NaN) can never reach the accumulators.
            start = (g * tiles_per_group + i) * tile_n
            lane = jax.lax.broadcasted_iota(jnp.int32, (1, tn), 1) + start
            valid = lane < n_total                          # (1, TN) bool
            x = jnp.where(valid, x, 0.0)
            lab = jnp.where(valid, lab, -1)                 # matches no class
            validf = valid.astype(jnp.float32)

        if binary:
            # PyTorch C==1 path, channel 0 only: p0 = sigmoid(x) and the
            # reordered one-hot puts (true == 1) in channel 0.  Channel 1 is
            # derived analytically in the JAX epilogue.
            p = 1.0 / (1.0 + jnp.exp(-x))                   # (1, TN)
            onehot = (lab == 1).astype(jnp.float32)         # (1, TN)
        else:
            m = jnp.max(x, axis=0, keepdims=True)
            e = jnp.exp(x - m)
            s = jnp.sum(e, axis=0, keepdims=True)           # (1, TN)
            p = e * (1.0 / s)                               # hoisted reciprocal
            cls = jax.lax.broadcasted_iota(jnp.int32, (c_in, 1), 0)
            onehot = (cls == lab).astype(jnp.float32)       # (C_in, TN)

        if use_mask:
            p = p * validf                 # onehot already masked via lab = -1

        out_ref[0] += chunk_sum(p * onehot)                 # intersections
        out_ref[1] += chunk_sum(p)                          # sum(p)
        out_ref[2] += chunk_sum(onehot)                     # sum(onehot)

    if any_partial:
        glob = g * tiles_per_group + i
        is_partial = (glob + 1) * tile_n > n_total          # traced scalar bool

        @pl.when(jnp.logical_not(is_partial))
        def _():
            accumulate(use_mask=False)

        @pl.when(is_partial)
        def _():
            accumulate(use_mask=True)
    else:
        accumulate(use_mask=False)                          # mask-free fast path


def _pick_tile_n(n, c_in, itemsize, lbl_itemsize, budget_bytes):
    """Largest comfortable lane tile: multiple of 128 (>= 2048 when possible),
    sized so the 2x-buffered HBM blocks PLUS ~6 tile-sized f32 in-kernel
    temporaries fit within `budget_bytes`."""
    if n < 128:
        return n                                   # single full-extent tile
    per_lane = 2 * (c_in * itemsize + lbl_itemsize) + 6 * c_in * 4
    tn = int(budget_bytes // per_lane)
    tn = max(2048, min(tn, 8192))
    tn = _round_down_128(tn)
    tn = min(tn, _round_down_128(n))
    return max(tn, 128)


def _tversky_sums(logits_bcn, labels_b1n, *, binary, tile_n=None):
    b, c_in, n = logits_bcn.shape
    itemsize = logits_bcn.dtype.itemsize
    lbl_itemsize = labels_b1n.dtype.itemsize
    c_k = 1 if binary else c_in                    # channels computed in-kernel

    ceiling = _vmem_ceiling_bytes()
    if tile_n is None:
        tile_n = _pick_tile_n(n, c_in, itemsize, lbl_itemsize,
                              budget_bytes=(ceiling * 3) // 5)
    else:
        tile_n = int(tile_n)
        if n >= 128:
            tile_n = min(max(_round_down_128(tile_n), 128), _round_down_128(n))
        else:
            tile_n = n
    lane_w = 128 if tile_n >= 128 else tile_n

    t_real = pl.cdiv(n, tile_n)
    # Keep v7x's second TensorCore busy when the batch alone can't: split the
    # lane-tile axis into a leading "parallel" group axis (negligible cost on
    # single-TC v5e/v6e).
    num_groups = 2 if (b % 2 == 1 and t_real >= 2) else 1
    tiles_per_group = pl.cdiv(t_real, num_groups)
    any_partial = (num_groups * tiles_per_group * tile_n) != n
    t_last = t_real - 1

    # Scoped-VMEM request: 2x-buffered inputs + ~6 f32 tile temporaries +
    # output block, with headroom, clamped to ~50% of physical VMEM.
    est = (2 * tile_n * (c_in * itemsize + lbl_itemsize)
           + 6 * c_in * tile_n * 4
           + 8 * 3 * c_k * lane_w * 4)
    vmem_limit = int(min(max(est * 3 // 2 + (4 << 20), 16 << 20), ceiling))

    def in_map(bi, g, i):
        # Clamp overhang steps onto the last real tile; their lanes are fully
        # masked in-kernel, so the duplicated data contributes nothing.
        return (bi, 0, jnp.minimum(g * tiles_per_group + i, t_last))

    kernel = functools.partial(
        _tversky_sums_kernel, n_total=n, tile_n=tile_n,
        tiles_per_group=tiles_per_group, any_partial=any_partial, binary=binary)

    return pl.pallas_call(
        kernel,
        out_shape=jax.ShapeDtypeStruct((b, num_groups, 3, c_k, lane_w),
                                       jnp.float32),
        grid_spec=pltpu.PrefetchScalarGridSpec(
            num_scalar_prefetch=0,
            grid=(b, num_groups, tiles_per_group),
            in_specs=[
                # None == squeezed batch dim in the kernel view.
                pl.BlockSpec((None, c_in, tile_n), in_map),
                pl.BlockSpec((None, 1, tile_n), in_map),
            ],
            out_specs=pl.BlockSpec((None, None, 3, c_k, lane_w),
                                   lambda bi, g, i: (bi, g, 0, 0, 0)),
        ),
        compiler_params=pltpu.CompilerParams(
            dimension_semantics=("parallel", "parallel", "arbitrary"),
            vmem_limit_bytes=vmem_limit),
    )(logits_bcn, labels_b1n)                       # (B, G, 3, C_k, lane_w)


def tversky_loss(logits, true, alpha=0.5, beta=0.5, eps=1e-7, tile_n=None):
    """Pallas-backed TverskyLoss.forward.

    logits: [B, C, H, W] float (f32 or bf16); true: [B, 1, H, W] or [B, H, W]
    integer labels.  Per-class reduction is over batch + spatial dims (the
    [B, 1, H, W] convention of the PyTorch module).
    """
    # TODO(synk): the PyTorch module reduces over dims (0, 2) when `true` is
    # 3-D [B, H, W]; this implementation always uses the [B, 1, H, W]
    # convention (reduce over batch + all spatial dims).
    if true.ndim == 4:
        true = true[:, 0]
    b, c, h, w = logits.shape
    n = h * w
    binary = (c == 1)

    logits_bcn = logits.reshape(b, c, n)                    # free reshape (NCHW)
    lbl_dtype = jnp.int8 if c <= 128 else jnp.int32         # shrink label traffic
    labels_b1n = true.astype(lbl_dtype).reshape(b, 1, n)

    part = _tversky_sums(logits_bcn, labels_b1n, binary=binary, tile_n=tile_n)
    sums = jnp.sum(part, axis=(0, 1, 4))                    # (3, C_k)
    inter, p_sum, t_sum = sums[0], sums[1], sums[2]

    if binary:
        # Channel 1 is fully determined by channel 0 (p1 = 1-p0, oh1 = 1-oh0).
        nvalid = jnp.float32(b * n)
        i0, p0, t0 = inter[0], p_sum[0], t_sum[0]
        inter = jnp.stack([i0, nvalid - p0 - t0 + i0])
        p_sum = jnp.stack([p0, nvalid - p0])
        t_sum = jnp.stack([t0, nvalid - t0])

    fps = p_sum - inter                                     # sum p * (1 - onehot)
    fns = t_sum - inter                                     # sum (1 - p) * onehot
    denom = inter + alpha * fps + beta * fns
    tversky = jnp.mean(inter / (denom + eps))
    return 1.0 - tversky


# ----------------------------------------------------------------------------
# Pure-JAX references (for correctness checking only).
# ----------------------------------------------------------------------------
def _tversky_loss_ref_multiclass(logits, true, alpha=0.5, beta=0.5, eps=1e-7):
    t = true[:, 0] if true.ndim == 4 else true
    c = logits.shape[1]
    oh = jnp.transpose(jax.nn.one_hot(t, c, dtype=jnp.float32), (0, 3, 1, 2))
    p = jax.nn.softmax(logits.astype(jnp.float32), axis=1)
    dims = (0, 2, 3)
    inter = jnp.sum(p * oh, dims)
    fps = jnp.sum(p * (1.0 - oh), dims)
    fns = jnp.sum((1.0 - p) * oh, dims)
    return 1.0 - jnp.mean(inter / (inter + alpha * fps + beta * fns + eps))


def _tversky_loss_ref_binary(logits, true, alpha=0.5, beta=0.5, eps=1e-7):
    t = true[:, 0] if true.ndim == 4 else true
    pos = jax.nn.sigmoid(logits.astype(jnp.float32))        # [B,1,H,W]
    probas = jnp.concatenate([pos, 1.0 - pos], axis=1)      # [B,2,H,W]
    oh = jnp.transpose(jax.nn.one_hot(t, 2, dtype=jnp.float32), (0, 3, 1, 2))
    oh = jnp.concatenate([oh[:, 1:2], oh[:, 0:1]], axis=1)  # reordered one-hot
    dims = (0, 2, 3)
    inter = jnp.sum(probas * oh, dims)
    fps = jnp.sum(probas * (1.0 - oh), dims)
    fns = jnp.sum((1.0 - probas) * oh, dims)
    return 1.0 - jnp.mean(inter / (inter + alpha * fps + beta * fns + eps))


if __name__ == "__main__":
    key = jax.random.PRNGKey(0)
    ks = jax.random.split(key, 12)

    # 1) Multi-class path (f32).
    B, C, H, W = 2, 4, 16, 16
    logits = jax.random.normal(ks[0], (B, C, H, W), dtype=jnp.float32)
    true = jax.random.randint(ks[1], (B, 1, H, W), 0, C, dtype=jnp.int32)
    loss = tversky_loss(logits, true)
    jax.block_until_ready(loss)
    ref = _tversky_loss_ref_multiclass(logits, true)
    assert jnp.allclose(loss, ref, atol=1e-5, rtol=1e-5), (loss, ref)

    # 2) Binary (C == 1, sigmoid) path.
    logits_b = jax.random.normal(ks[2], (2, 1, 16, 16), dtype=jnp.float32)
    true_b = jax.random.randint(ks[3], (2, 1, 16, 16), 0, 2, dtype=jnp.int32)
    loss_b = tversky_loss(logits_b, true_b)
    jax.block_until_ready(loss_b)
    ref_b = _tversky_loss_ref_binary(logits_b, true_b)
    assert jnp.allclose(loss_b, ref_b, atol=1e-5, rtol=1e-5), (loss_b, ref_b)

    # 3) Partial last tile + B==1 group split (masked path, 2 groups).
    logits_p = jax.random.normal(ks[4], (1, 3, 13, 13), dtype=jnp.float32)
    true_p = jax.random.randint(ks[5], (1, 1, 13, 13), 0, 3, dtype=jnp.int32)
    loss_p = tversky_loss(logits_p, true_p, tile_n=128)
    jax.block_until_ready(loss_p)
    ref_p = _tversky_loss_ref_multiclass(logits_p, true_p)
    assert jnp.allclose(loss_p, ref_p, atol=1e-5, rtol=1e-5), (loss_p, ref_p)

    # 4) Group split with an overhang (duplicated, fully-masked) step.
    logits_o = jax.random.normal(ks[6], (1, 3, 19, 19), dtype=jnp.float32)
    true_o = jax.random.randint(ks[7], (1, 1, 19, 19), 0, 3, dtype=jnp.int32)
    loss_o = tversky_loss(logits_o, true_o, tile_n=128)
    jax.block_until_ready(loss_o)
    ref_o = _tversky_loss_ref_multiclass(logits_o, true_o)
    assert jnp.allclose(loss_o, ref_o, atol=1e-5, rtol=1e-5), (loss_o, ref_o)

    # 5) bf16-on-the-wire logits, in-kernel f32 upcast.
    logits_h = jax.random.normal(ks[8], (2, 5, 16, 16)).astype(jnp.bfloat16)
    true_h = jax.random.randint(ks[9], (2, 1, 16, 16), 0, 5, dtype=jnp.int32)
    loss_h = tversky_loss(logits_h, true_h)
    jax.block_until_ready(loss_h)
    ref_h = _tversky_loss_ref_multiclass(logits_h, true_h)
    assert jnp.allclose(loss_h, ref_h, atol=1e-5, rtol=1e-5), (loss_h, ref_h)

    # 6) Tiny spatial extent (n < 128): single full-extent tile fallback.
    logits_t = jax.random.normal(ks[10], (1, 2, 8, 8), dtype=jnp.float32)
    true_t = jax.random.randint(ks[11], (1, 1, 8, 8), 0, 2, dtype=jnp.int32)
    loss_t = tversky_loss(logits_t, true_t)
    jax.block_until_ready(loss_t)
    ref_t = _tversky_loss_ref_multiclass(logits_t, true_t)
    assert jnp.allclose(loss_t, ref_t, atol=1e-5, rtol=1e-5), (loss_t, ref_t)

    print("KERNEL_OK")
</pallas_src>

<mosaic_0001>
module attributes {stable_mosaic.version = 11 : i64} {
  func.func @_tversky_sums_kernel(%arg0: i32, %arg1: i32, %arg2: i32, %arg3: memref<1x4x256xf32, #tpu.memory_space<vmem>>, %arg4: memref<1x1x256xi8, #tpu.memory_space<vmem>>, %arg5: memref<1x1x3x4x128xf32, #tpu.memory_space<vmem>>) attributes {dimension_semantics = [#tpu.dimension_semantics<parallel>, #tpu.dimension_semantics<parallel>, #tpu.dimension_semantics<arbitrary>], iteration_bounds = array<i64: 2, 1, 1>, scalar_prefetch = 0 : i64, scratch_operands = 0 : i64, tpu.core_type = #tpu.core_type<tc>, window_params = [{transform_indices = @transform_0, window_bounds = array<i64: 1, 4, 256>}, {transform_indices = @transform_1, window_bounds = array<i64: 1, 1, 256>}, {transform_indices = @transform_2, window_bounds = array<i64: 1, 1, 3, 4, 128>}]} {
    %c0_i32 = arith.constant 0 : i32
    %0 = arith.cmpi eq, %arg2, %c0_i32 : i32
    %1 = arith.extui %0 : i1 to i32
    %c0_i32_0 = arith.constant 0 : i32
    %2 = arith.cmpi ne, %1, %c0_i32_0 : i32
    scf.if %2 {
      %cst_36 = arith.constant 0.000000e+00 : f32
      %53 = vector.broadcast %cst_36 : f32 to vector<3x4x128xf32>
      %c0_37 = arith.constant 0 : index
      %c0_38 = arith.constant 0 : index
      %c0_39 = arith.constant 0 : index
      %c0_40 = arith.constant 0 : index
      %c0_41 = arith.constant 0 : index
      %54 = vector.load %arg5[%c0_37, %c0_38, %c0_39, %c0_40, %c0_41] : memref<1x1x3x4x128xf32, #tpu.memory_space<vmem>>, vector<1x1x3x4x128xf32>
      %55 = vector.shape_cast %54 : vector<1x1x3x4x128xf32> to vector<3x4x128xf32>
      %56 = vector.shape_cast %53 : vector<3x4x128xf32> to vector<1x1x3x4x128xf32>
      tpu.vector_store %arg5[%c0_37, %c0_38, %c0_39, %c0_40, %c0_41], %56 {strides = array<i32>} : memref<1x1x3x4x128xf32, #tpu.memory_space<vmem>>, vector<1x1x3x4x128xf32>,
    } else {
    }
    %c0 = arith.constant 0 : index
    %c0_1 = arith.constant 0 : index
    %c0_2 = arith.constant 0 : index
    %3 = vector.load %arg3[%c0, %c0_1, %c0_2] : memref<1x4x256xf32, #tpu.memory_space<vmem>>, vector<1x4x256xf32>
    %4 = vector.shape_cast %3 : vector<1x4x256xf32> to vector<4x256xf32>
    %c0_3 = arith.constant 0 : index
    %c0_4 = arith.constant 0 : index
    %c0_5 = arith.constant 0 : index
    %5 = vector.load %arg4[%c0_3, %c0_4, %c0_5] : memref<1x1x256xi8, #tpu.memory_space<vmem>>, vector<1x1x256xi8>
    %6 = vector.shape_cast %5 : vector<1x1x256xi8> to vector<1x256xi8>
    %7 = arith.extsi %6 : vector<1x256xi8> to vector<1x256xi32>
    %cst = arith.constant dense<0xFF800000> : vector<256xf32>
    %8 = vector.multi_reduction <maximumf>, %4, %cst [0] : vector<4x256xf32> to vector<256xf32>
    %9 = vector.shape_cast %8 : vector<256xf32> to vector<1x256xf32>
    %10 = vector.broadcast %9 : vector<1x256xf32> to vector<4x256xf32>
    %11 = arith.subf %4, %10 : vector<4x256xf32>
    %12 = math.exp %11 : vector<4x256xf32>
    %cst_6 = arith.constant dense<0.000000e+00> : vector<256xf32>
    %13 = vector.multi_reduction <add>, %12, %cst_6 [0] : vector<4x256xf32> to vector<256xf32>
    %14 = vector.shape_cast %13 : vector<256xf32> to vector<1x256xf32>
    %cst_7 = arith.constant 1.000000e+00 : f32
    %15 = vector.broadcast %cst_7 : f32 to vector<1x256xf32>
    %16 = arith.divf %15, %14 : vector<1x256xf32>
    %17 = vector.broadcast %16 : vector<1x256xf32> to vector<4x256xf32>
    %18 = arith.mulf %12, %17 : vector<4x256xf32>
    %19 = tpu.iota {dimensions = array<i32: 0>} : vector<4x1xi32>
    %20 = vector.broadcast %19 : vector<4x1xi32> to vector<4x256xi32>
    %21 = vector.broadcast %7 : vector<1x256xi32> to vector<4x256xi32>
    %22 = arith.cmpi eq, %20, %21 : vector<4x256xi32>
    %23 = arith.extui %22 : vector<4x256xi1> to vector<4x256xi32>
    %24 = arith.sitofp %23 : vector<4x256xi32> to vector<4x256xf32>
    %c0_8 = arith.constant 0 : index
    %c0_9 = arith.constant 0 : index
    %c0_10 = arith.constant 0 : index
    %c0_11 = arith.constant 0 : index
    %c0_12 = arith.constant 0 : index
    %25 = vector.load %arg5[%c0_8, %c0_9, %c0_10, %c0_11, %c0_12] : memref<1x1x3x4x128xf32, #tpu.memory_space<vmem>>, vector<1x1x1x4x128xf32>
    %26 = vector.shape_cast %25 : vector<1x1x1x4x128xf32> to vector<4x128xf32>
    %27 = arith.mulf %18, %24 : vector<4x256xf32>
    %28 = vector.extract_strided_slice %27 {offsets = [0, 0], sizes = [4, 128], strides = [1, 1]} : vector<4x256xf32> to vector<4x128xf32>
    %29 = vector.extract_strided_slice %27 {offsets = [0, 128], sizes = [4, 128], strides = [1, 1]} : vector<4x256xf32> to vector<4x128xf32>
    %30 = arith.addf %28, %29 : vector<4x128xf32>
    %31 = arith.addf %26, %30 : vector<4x128xf32>
    %c0_13 = arith.constant 0 : index
    %c0_14 = arith.constant 0 : index
    %c0_15 = arith.constant 0 : index
    %c0_16 = arith.constant 0 : index
    %c0_17 = arith.constant 0 : index
    %32 = vector.load %arg5[%c0_13, %c0_14, %c0_15, %c0_16, %c0_17] : memref<1x1x3x4x128xf32, #tpu.memory_space<vmem>>, vector<1x1x1x4x128xf32>
    %33 = vector.shape_cast %32 : vector<1x1x1x4x128xf32> to vector<4x128xf32>
    %34 = vector.shape_cast %31 : vector<4x128xf32> to vector<1x1x1x4x128xf32>
    tpu.vector_store %arg5[%c0_13, %c0_14, %c0_15, %c0_16, %c0_17], %34 {strides = array<i32>} : memref<1x1x3x4x128xf32, #tpu.memory_space<vmem>>, vector<1x1x1x4x128xf32>,
    %c0_18 = arith.constant 0 : index
    %c0_19 = arith.constant 0 : index
    %c1 = arith.constant 1 : index
    %c0_20 = arith.constant 0 : index
    %c0_21 = arith.constant 0 : index
    %35 = vector.load %arg5[%c0_18, %c0_19, %c1, %c0_20, %c0_21] : memref<1x1x3x4x128xf32, #tpu.memory_space<vmem>>, vector<1x1x1x4x128xf32>
    %36 = vector.shape_cast %35 : vector<1x1x1x4x128xf32> to vector<4x128xf32>
    %37 = vector.extract_strided_slice %18 {offsets = [0, 0], sizes = [4, 128], strides = [1, 1]} : vector<4x256xf32> to vector<4x128xf32>
    %38 = vector.extract_strided_slice %18 {offsets = [0, 128], sizes = [4, 128], strides = [1, 1]} : vector<4x256xf32> to vector<4x128xf32>
    %39 = arith.addf %37, %38 : vector<4x128xf32>
    %40 = arith.addf %36, %39 : vector<4x128xf32>
    %c0_22 = arith.constant 0 : index
    %c0_23 = arith.constant 0 : index
    %c1_24 = arith.constant 1 : index
    %c0_25 = arith.constant 0 : index
    %c0_26 = arith.constant 0 : index
    %41 = vector.load %arg5[%c0_22, %c0_23, %c1_24, %c0_25, %c0_26] : memref<1x1x3x4x128xf32, #tpu.memory_space<vmem>>, vector<1x1x1x4x128xf32>
    %42 = vector.shape_cast %41 : vector<1x1x1x4x128xf32> to vector<4x128xf32>
    %43 = vector.shape_cast %40 : vector<4x128xf32> to vector<1x1x1x4x128xf32>
    tpu.vector_store %arg5[%c0_22, %c0_23, %c1_24, %c0_25, %c0_26], %43 {strides = array<i32>} : memref<1x1x3x4x128xf32, #tpu.memory_space<vmem>>, vector<1x1x1x4x128xf32>,
    %c0_27 = arith.constant 0 : index
    %c0_28 = arith.constant 0 : index
    %c2 = arith.constant 2 : index
    %c0_29 = arith.constant 0 : index
    %c0_30 = arith.constant 0 : index
    %44 = vector.load %arg5[%c0_27, %c0_28, %c2, %c0_29, %c0_30] : memref<1x1x3x4x128xf32, #tpu.memory_space<vmem>>, vector<1x1x1x4x128xf32>
    %45 = vector.shape_cast %44 : vector<1x1x1x4x128xf32> to vector<4x128xf32>
    %46 = vector.extract_strided_slice %24 {offsets = [0, 0], sizes = [4, 128], strides = [1, 1]} : vector<4x256xf32> to vector<4x128xf32>
    %47 = vector.extract_strided_slice %24 {offsets = [0, 128], sizes = [4, 128], strides = [1, 1]} : vector<4x256xf32> to vector<4x128xf32>
    %48 = arith.addf %46, %47 : vector<4x128xf32>
    %49 = arith.addf %45, %48 : vector<4x128xf32>
    %c0_31 = arith.constant 0 : index
    %c0_32 = arith.constant 0 : index
    %c2_33 = arith.constant 2 : index
    %c0_34 = arith.constant 0 : index
    %c0_35 = arith.constant 0 : index
    %50 = vector.load %arg5[%c0_31, %c0_32, %c2_33, %c0_34, %c0_35] : memref<1x1x3x4x128xf32, #tpu.memory_space<vmem>>, vector<1x1x1x4x128xf32>
    %51 = vector.shape_cast %50 : vector<1x1x1x4x128xf32> to vector<4x128xf32>
    %52 = vector.shape_cast %49 : vector<4x128xf32> to vector<1x1x1x4x128xf32>
    tpu.vector_store %arg5[%c0_31, %c0_32, %c2_33, %c0_34, %c0_35], %52 {strides = array<i32>} : memref<1x1x3x4x128xf32, #tpu.memory_space<vmem>>, vector<1x1x1x4x128xf32>,
    return
  }
  func.func @transform_0(%arg0: i32, %arg1: i32, %arg2: i32) -> (i32, i32, i32) {
    %c1_i32 = arith.constant 1 : i32
    %0 = arith.muli %arg1, %c1_i32 : i32
    %1 = arith.addi %0, %arg2 : i32
    %c0_i32 = arith.constant 0 : i32
    %2 = arith.minsi %1, %c0_i32 : i32
    %c0_i32_0 = arith.constant 0 : i32
    %c0_i32_1 = arith.constant 0 : i32
    return %arg0, %c0_i32_0, %2 : i32, i32, i32
  }
  func.func @transform_1(%arg0: i32, %arg1: i32, %arg2: i32) -> (i32, i32, i32) {
    %c1_i32 = arith.constant 1 : i32
    %0 = arith.muli %arg1, %c1_i32 : i32
    %1 = arith.addi %0, %arg2 : i32
    %c0_i32 = arith.constant 0 : i32
    %2 = arith.minsi %1, %c0_i32 : i32
    %c0_i32_0 = arith.constant 0 : i32
    %c0_i32_1 = arith.constant 0 : i32
    return %arg0, %c0_i32_0, %2 : i32, i32, i32
  }
  func.func @transform_2(%arg0: i32, %arg1: i32, %arg2: i32) -> (i32, i32, i32, i32, i32) {
    %c0_i32 = arith.constant 0 : i32
    %c0_i32_0 = arith.constant 0 : i32
    %c0_i32_1 = arith.constant 0 : i32
    %c0_i32_2 = arith.constant 0 : i32
    return %arg0, %arg1, %c0_i32, %c0_i32_0, %c0_i32_1 : i32, i32, i32, i32, i32
  }
}

</mosaic_0001>

<bundles_post_ra>
// kernel: tpu_custom_call.1
= control target key start
LH: loop header
LB: loop body
LE: loop exit
PB: predicated region body
PF: predicated region fallthrough
CT: control target
= control target key end

     0   :  { %7 = vsyncpa [#allocation3], 0  ;;  %s907_s0 = inlined_call_operand.hbm [shape: f32[2,4,256], index: 0, kind: input, shape index: {}]   ;;  %s908_s1 = inlined_call_operand.vmem [shape: s8[2,1,256], index: 1, kind: input, shape index: {}]   ;;  %s909_s2 = inlined_call_operand.hbm [shape: f32[2,1,3,4,128], index: 2, kind: output, shape index: {}]  }
   0x1   :  { %9 = vsyncpa [#allocation3 + $0x1], 0 }
   0x2   :  { %10 = vsyncpa [#allocation4], 0 }
   0x3   :  { %12 = vsyncpa [#allocation4 + $0x1], 0  ;;  %s711_s9 = smov 0   ;;  %s713_s10 = smov 0  }
   0x4   :  { %s715_s11 = smov 0   ;;  %s717_s12 = smov 0  }
   0x5   :  { %s719_s13 = smov 0   ;;  %s721_s14 = smov 0  }
   0x6 LB: > { %s483_s15 = sadd.s32 4294967295, %s689_s14   ;;  %s484_s16 = sadd.s32 4294967294, %s689_s14   ;;  %s689_s14 = sphi %s721_s14, %s18_s14   ;;  %s685_s13 = sphi %s719_s13, %s925_s13   ;;  %s681_s12 = sphi %s717_s12, %s924_s12   ;;  %s677_s11 = sphi %s715_s11, %s923_s11   ;;  %s673_s10 = sphi %s713_s10, %s922_s10   ;;  %s669_s9 = sphi %s711_s9, %s921_s9  }
   0x7   : > { %s37_s17 = sadd.s32 1, %s685_s13  ;;  %s52_s18 = sadd.s32 1, %s677_s11 }
   0x8   : > { %p39_p0 = scmp.ge.s32.totalorder %s37_s17, 2  ;;  %p59_p1 = scmp.ne.s32.totalorder %s677_s11, %s673_s10 }
   0x9   : > { %p60_p2 = scmp.eq.s32.totalorder %s689_s14, 0  ;;  %p65_p3 = scmp.ne.s32.totalorder %s673_s10, %s669_s9 }
   0xa   : > { %s927_s17 = smov (%p39_p0, %s37_s17), 0  ;;  %p66_p5 = scmp.eq.s32.totalorder %s483_s15, 0 }
   0xb   : > { %p752_p4 = por %p60_p2, %p59_p1  ;;  %s47_s20 = ssub.s32 %s685_s13, %s927_s17 }
   0xc   : > { %p125_p6 = scmp.eq.s32.totalorder %s483_s15, 1  ;;  %p50_p7 = scmp.eq.s32.totalorder %s47_s20, 0 }
   0xd   : > { %p758_p8 = por %p66_p5, %p65_p3  ;;  %p131_p10 = scmp.eq.s32.totalorder %s484_s16, 1 }
   0xe   : > { %p762_p9 = por %p125_p6, %p59_p1  ;;  %p517_p13 = scmp.lt.s32.totalorder %s689_s14, 2 }
   0xf   : > { %s767_s23 = scalar_select %p50_p7, %s677_s11, %s52_s18  }
  0x10   : > { %s913_s22 = scalar_select %p762_p9, 1, 0 }
  0x11   : > { %p769_p11 = por %p131_p10, %p65_p3  ;;  %s151_s25 = sand.u32 1, %s677_s11  }
  0x12   : > { %s487_s26 = sshll.u32 %s151_s25, 3  ;;  %s502_s27 = sshll.u32 %s685_s13, 7 }
  0x13   : > { %s914_s24 = scalar_select %p769_p11, 1, 0 }
  0x14   : > { %s780_s30 = scalar_lea.hbm %s907_s0, %s502_s27  ;;  %s155_s3 = scalar_lea.vmem [#allocation2], %s487_s26 }
  0x15   : > { %s168_s4 = sshll.u32 %s155_s3, 4  ;;  %p786_p0 = pnand %p517_p13, %p752_p4  ;;  %s782_s4 = int_to_ptr.vmem [resolvable:$true] %s168_s4 }
  0x16   : > { %s152_s6 = scalar_lea.sflag [#allocation3], %s151_s25  ;;  %s577_s7 = scalar_lea.hbm %s780_s30, 128 }
  0x17   : > { %p578_p3 = scmp.ne.s32.totalorder %s780_s30, %s577_s7  ;;  %p579_p5 = pneg %p786_p0 }
  0x18   : > { %s582_s16 = scalar_lea.hbm %s907_s0, 256  ;;  %p583_p4 = scmp.lt.u32.totalorder %s780_s30, %s907_s0 }
  0x19   : > { %p580_p6 = pnand %p579_p5, %p578_p3  ;;  %p584_p10 = scmp.lt.u32.totalorder %s582_s16, %s577_s7 }
  0x1a   : > { %p586_p12 = scmp.lt.u32.totalorder %s577_s7, %s780_s30 }
  0x1b   : > { %p581_p7 = pneg %p580_p6  ;;  %p585_p13 = por %p584_p10, %p583_p4 }
  0x1d   : > { %p587_p1 = por %p586_p12, %p585_p13 }
  0x1f   : > { %p588_p2 = pnand %p587_p1, %p581_p7 }
  0x21   : > { %591 = shalt.err (!%p588_p2)
}
  0x22   : > { %s592_s20 = scalar_lea.vmem %s782_s4, 128  ;;  %s691_s25 = smov [#allocation2]  }
  0x23   : > { %p593_p3 = scmp.ne.s32.totalorder %s782_s4, %s592_s20  ;;  %s597_s26 = sshll.u32 %s691_s25, 4  ;;  %s598_s26 = int_to_ptr.vmem [resolvable:$false] %s597_s26 }
  0x24   : > { %s599_s27 = scalar_lea.vmem %s598_s26, 256  ;;  %p600_p9 = scmp.lt.s32.totalorder %s782_s4, %s598_s26 }
  0x25   : > { %p595_p6 = pnand %p593_p3, %p579_p5  ;;  %p601_p4 = scmp.lt.s32.totalorder %s599_s27, %s592_s20 }
  0x27   : > { %p596_p11 = pneg %p595_p6  ;;  %p602_p10 = por %p601_p4, %p600_p9 }
  0x29   : > { %p603_p12 = pnand %p602_p10, %p596_p11 }
  0x2b   : > { %606 = shalt.err (!%p603_p12)
}
  0x2c   : > { %512 = dma.hbm_to_vmem [thread:$0]  (!%p786_p0), %s780_s30, 128, %s782_s4, %s152_s6  }
  0x2d   : > { %p916_p1 = scmp.lt.s32.totalorder %s689_s14, 3  ;;  %p917_p2 = scmp.ge.s32.totalorder %s689_s14, 1 }
  0x2f   : > { %p192_p5 = pnand %p917_p2, %p916_p1 }
  0x30   : > { %s822_s28 = sand.u32 (!%p192_p5), 1, %s673_s10  }
  0x31   : > { %195 = sbr.rel (%p192_p5) target bundleno = 144 (0x90), region = 28  ;;  %s491_s29 = sshll.u32 (!%p192_p5), %s822_s28, 3 }
  0x32   : > { %s198_s3 = scalar_lea.sflag (!%p192_p5), [#allocation3], %s822_s28  ;;  %s201_s7 = scalar_lea.vmem (!%p192_p5), [#allocation2], %s491_s29 }
  0x38   : > { %660 = dma.done.wait (%p758_p8), %s198_s3, 128  }
  0x39   : > { %662 = vsyncadd (%p758_p8), %s198_s3, 4294967168  ;;  %s503_s30 = smul.u32 12, %s822_s28  ;;  %p241_p9 = scmp.lt.s32.totalorder %s681_s12, 1  ;;  %v313_v0 = vlaneseq  ;;  %v692_v2 = vmov 0.0   ;;  %vm265_vm0 = vcmask 1043456   ;;  %v259_v6 = vld [vmem:[%s201_s7] sm:$0xff] }
  0x3a   : > { %v263_v8 = vcombine.high %v259_v6, %v259_v6  ;;  %v266_v9 = vsel %vm265_vm0, %v259_v6, -inf  ;;  %s504_s16 = smul.u32 192, %s681_s12  ;;  %p918_p11 = scmp.ne.s32.totalorder %s913_s22, 0 }
  0x3b   : > { %v314_v1 = vshrl.u32 %v313_v0, 7  ;;  %s242_s4 = scalar_select %p241_p9, %s681_s12, 1  ;;  %v267_v10 = vrot.slane %v266_v9, 4 }
  0x3c   : > { %s833_s5 = scalar_lea.vmem [#allocation5], %s503_s30  ;;  %v273_v13 = vsel %vm265_vm0, %v263_v8, -inf  ;;  %s854_s25 = scalar_lea.hbm %s909_s2, %s504_s16 }
  0x3d   : > { %256 = vst [vmem:[%s833_s5] sm:$0xf] %v692_v2  ;;  %257 = vst [vmem:[%s833_s5 + $0x4] sm:$0xf] %v692_v2  ;;  %s492_s6 = sshll.u32 %s242_s4, 1  ;;  %v317_v3 = vsub.s32 0, %v314_v1  ;;  %v321_v4 = vsub.s32 4, %v314_v1  ;;  %v268_v14 = vmax.f32 %v266_v9, %v267_v10 }
  0x3e   : > { %258 = vst [vmem:[%s833_s5 + $0x8] sm:$0xf] %v692_v2  ;;  %s247_s15 = scalar_lea.vmem %s908_s1, %s492_s6  ;;  %v274_v15 = vrot.slane %v273_v13, 4  ;;  %s378_s18 = sshll.u32 %s833_s5, 4  ;;  %s857_s18 = int_to_ptr.vmem [resolvable:$true] %s378_s18 }
  0x3f   : > { %v260_v5 = vld [vmem:[%s247_s15] sm:$0x3]  ;;  %v269_v18 = vrot.slane %v268_v14, 2  ;;  %s363_s12 = scalar_lea.sflag [#allocation4], %s822_s28  ;;  %s607_s26 = scalar_lea.vmem %s857_s18, 192 }
  0x40   : > { %v261_v7 = vunpack.c.0.s8 %v260_v5  ;;  %v275_v19 = vmax.f32 %v273_v13, %v274_v15  ;;  %p608_p8 = scmp.ne.s32.totalorder %s857_s18, %s607_s26  ;;  %s693_s27 = smov [#allocation5]  }
  0x41   : > { %v270_v22 = vmax.f32 %v268_v14, %v269_v18  ;;  %s611_s29 = sshll.u32 %s693_s27, 4  ;;  %s612_s29 = int_to_ptr.vmem [resolvable:$false] %s611_s29 }
  0x42   : > { %v318_v11 = vrot.slane %v261_v7, %v317_v3  ;;  %v322_v12 = vrot.slane %v261_v7, %v321_v4  ;;  %v276_v23 = vrot.slane %v275_v19, 2  ;;  %p609_p0 = pnand %p608_p8, %p918_p11  ;;  %s613_s3 = scalar_lea.vmem %s612_s29, 384 }
  0x43   : > { %v271_v26 = vrot.slane %v270_v22, 1  ;;  %p614_p13 = scmp.lt.s32.totalorder %s857_s18, %s612_s29  ;;  %p615_p3 = scmp.lt.s32.totalorder %s613_s3, %s607_s26 }
  0x44   : > { %v326_v16 = vrot.slane %v318_v11, %v317_v3  ;;  %v330_v17 = vrot.slane %v322_v12, %v317_v3  ;;  %v277_v27 = vmax.f32 %v275_v19, %v276_v23  ;;  %v495_v58 = vld [vmem:[%s833_s5 + $0x4] sm:$0xf]  ;;  %v337_v61 = vld [vmem:[%s833_s5] sm:$0xf]  ;;  %p610_p7 = pneg %p609_p0 }
  0x45   : > { %v497_v24 = vld [vmem:[%s833_s5 + $0x8] sm:$0xf]  ;;  %v272_v29 = vmax.f32 %v270_v22, %v271_v26  ;;  %p616_p6 = por %p615_p3, %p614_p13 }
  0x46   : > { %vm331_vm1 = vcmp.eq.s32.totalorder %v314_v1, %v326_v16  ;;  %vm332_vm2 = vcmp.eq.s32.totalorder %v314_v1, %v330_v17  ;;  %v278_v30 = vrot.slane %v277_v27, 1 }
  0x47   : > { %v493_v20 = vsel %vm331_vm1, 1.0, %v692_v2  ;;  %v494_v21 = vsel %vm332_vm2, 1.0, %v692_v2  ;;  %p617_p4 = pnand %p616_p6, %p610_p7 }
  0x48   : > { %v359_v25 = vadd.f32 %v494_v21, %v493_v20  ;;  %v279_v31 = vmax.f32 %v277_v27, %v278_v30  ;;  %v340_v54 = vcombine.low %v493_v20, %v494_v21 }
  0x4a   : > { %v360_v28 = vadd.f32 %v497_v24, %v359_v25  ;;  %v282_v32 = vcombine.low %v272_v29, %v279_v31 }
  0x4c   : > { %498 = vst [vmem:[%s833_s5 + $0x8] sm:$0xf] %v360_v28  ;;  %v284_v33 = vsub.f32 %v259_v6, %v282_v32 }
  0x4e   : > { %v285_v34 = vmul.f32 1.442695, %v284_v33 }
  0x50   : > { %571 = vpow2.f32 %v285_v34 }
  0x5a   : > { %v572_v35 = vpop.eup %571 }
  0x5b   : > { %v288_v36 = vcombine.high %v572_v35, %v572_v35  ;;  %v290_v37 = vsel %vm265_vm0, %v572_v35, 0.0 }
  0x5c   : > { %v291_v38 = vrot.slane %v290_v37, 4 }
  0x5d   : > { %v297_v39 = vsel %vm265_vm0, %v288_v36, 0.0 }
  0x5e   : > { %v292_v40 = vadd.f32 %v291_v38, %v290_v37  ;;  %v298_v41 = vrot.slane %v297_v39, 4 }
  0x60   : > { %v293_v42 = vrot.slane %v292_v40, 2  ;;  %v299_v43 = vadd.f32 %v298_v41, %v297_v39 }
  0x62   : > { %v294_v44 = vadd.f32 %v293_v42, %v292_v40  ;;  %v300_v45 = vrot.slane %v299_v43, 2 }
  0x64   : > { %v295_v46 = vrot.slane %v294_v44, 1  ;;  %v301_v47 = vadd.f32 %v300_v45, %v299_v43 }
  0x66   : > { %v296_v48 = vadd.f32 %v295_v46, %v294_v44  ;;  %v302_v49 = vrot.slane %v301_v47, 1 }
  0x68   : > { %v303_v50 = vadd.f32 %v302_v49, %v301_v47  ;;  %573 = vrcp.f32 %v296_v48 }
  0x6a   : > { %575 = vrcp.f32 %v303_v50 }
  0x72   : > { %v574_v51 = vpop.eup %573 }
  0x74   : > { %v576_v52 = vpop.eup %575 }
  0x75   : > { %v310_v53 = vcombine.low %v574_v51, %v576_v52 }
  0x77   : > { %v312_v55 = vmul.f32 %v572_v35, %v310_v53 }
  0x79   : > { %v342_v56 = vmul.f32 %v340_v54, %v312_v55  ;;  %v352_v57 = vrot.slane %v312_v55, 4 }
  0x7b   : > { %v344_v59 = vrot.slane %v342_v56, 4  ;;  %v354_v60 = vadd.f32 %v352_v57, %v312_v55 }
  0x7d   : > { %v346_v62 = vadd.f32 %v344_v59, %v342_v56  ;;  %v355_v63 = vadd.f32 %v495_v58, %v354_v60 }
  0x7f   : > { %v347_v0 = vadd.f32 %v346_v62, %v337_v61  ;;  %496 = vst [vmem:[%s833_s5 + $0x4] sm:$0xf] %v355_v63 }
  0x81   : > { %348 = vst [vmem:[%s833_s5] sm:$0xf] %v347_v0 }
  0x82   : > { %620 = shalt.err (!%p617_p4)
}
  0x83   : > { %s621_s7 = scalar_lea.hbm %s854_s25, 192  ;;  %s625_s5 = scalar_lea.hbm %s909_s2, 384 }
  0x84   : > { %p622_p10 = scmp.ne.s32.totalorder %s854_s25, %s621_s7  ;;  %p626_p2 = scmp.lt.u32.totalorder %s854_s25, %s909_s2 }
  0x85   : > { %p627_p5 = scmp.lt.u32.totalorder %s625_s5, %s621_s7  ;;  %p629_p8 = scmp.lt.u32.totalorder %s621_s7, %s854_s25 }
  0x86   : > { %p623_p12 = pnand %p622_p10, %p918_p11 }
  0x87   : > { %p628_p9 = por %p627_p5, %p626_p2 }
  0x88   : > { %p624_p1 = pneg %p623_p12 }
  0x89   : > { %p630_p0 = por %p629_p8, %p628_p9 }
  0x8b   : > { %p631_p7 = pnand %p630_p0, %p624_p1 }
  0x8d   : > { %634 = shalt.err (!%p631_p7)
}
  0x8e   : > { %s694_s8 = smov 64   ;;  %s695_s15 = smov 4  }
  0x8f   : > { %507 = dma.vmem_to_hbm [thread:$0]  (%p918_p11), %s857_s18, 192, %s854_s25, %s363_s12, %s694_s8, %s694_s8, %s695_s15  }
  0x90 PF: > { %s393_s16 = sand.u32 1, %s669_s9   ;;  %p919_p13 = scmp.ne.s32.totalorder %s914_s24, 0 }
  0x91   : > { %p920_p3 = scmp.ge.s32.totalorder %s689_s14, 2  ;;  %s394_s19 = scalar_lea.sflag [#allocation4], %s393_s16 }
  0x93   : > { %p514_p6 = pnand %p920_p3, %p919_p13 }
  0x95   : > { %664 = dma.done.wait (!%p514_p6), %s394_s19, 192  }
  0x96   : > { %666 = vsyncadd (!%p514_p6), %s394_s19, 4294967104  ;;  %s18_s14 = sadd.s32 1, %s689_s14   ;;  %s921_s9 = smov %s673_s10 }
  0x97   : > { %p15_p4 = scmp.ge.s32.totalorder %s18_s14, 4   ;;  %s922_s10 = smov %s677_s11 }
  0x98   : > { %s923_s11 = smov %s767_s23  ;;  %s924_s12 = smov %s685_s13 }
  0x99   : > { %s925_s13 = smov %s927_s17  ;;  %17 = sbr.rel (!%p15_p4) target bundleno = 6 (0x6), region = 82 }
  0xa0   :  { %399 = vsyncpa [#allocation3], 1 }
  0xa1   :  { %401 = vsyncpa [#allocation3 + $0x1], 1 }
  0xa2   :  { %402 = vsyncpa [#allocation4], 1 }
  0xa3   :  { %404 = vsyncpa [#allocation4 + $0x1], 1 }

</bundles_post_ra>
